<compile_context>
chip_gen: v7x
topology: tpu7x:2x2x1
jax: 0.10.0
libtpu: 0.0.40
codegen_flags: <defaults>
</compile_context>

<pallas_src>
import jax
import jax.numpy as jnp
import numpy as np
from jax.experimental import pallas as pl
from jax.experimental.pallas import tpu as pltpu

NEG_SLOPE = 0.01   # nn.LeakyReLU() default negative_slope
BN_EPS = 1e-5      # nn.BatchNorm2d default eps


def _make_decoder_kernel(layer_dims, H0, W0):
    """Fused decoder over accumulated space-to-depth ("fold-plane") activations.

    layer_dims: list of (Cin, Cout, P) per layer.  Layer l's input is stored as P*P = 4**l
    fold planes of shape (Cin, S0) at base resolution S0 = H0*W0: native input position
    (P*rho + phi_y, P*gamma + phi_x) lives in plane (phi_y, phi_x) at base index rho*W0+gamma.

    Kernel refs: x, col_mask, row_mask, diag_mask, [w_t, scale, shift]*L, out, [plane scratch]*(L-1).
    """
    n_layers = len(layer_dims)
    S0 = H0 * W0

    def kernel(x_ref, cm_ref, rm_ref, dm_ref, *refs):
        w_refs = refs[0:3 * n_layers:3]
        sc_refs = refs[1:3 * n_layers:3]
        sh_refs = refs[2:3 * n_layers:3]
        o_ref = refs[3 * n_layers]
        bufs = refs[3 * n_layers + 1:]

        col_m = cm_ref[...]    # (1, S0) bf16 {0,1}: base column gamma < W0-1
        row_m = rm_ref[...]    # (1, S0)           : base row    rho   < H0-1
        dia_m = dm_ref[...]    # (1, S0)           : both

        def shift_flat(p, k):
            # out[:, s] = p[:, s + k]; positions whose flat shift crosses a base-row
            # boundary are zeroed by the caller's boundary mask.
            c = p.shape[0]
            return jnp.concatenate([p[:, k:], jnp.zeros((c, k), p.dtype)], axis=1)

        for l, (cin, cout, P) in enumerate(layer_dims):
            NF = P * P
            if l == 0:
                planes = [x_ref[0]]                          # the latent is the single plane
            else:
                planes = [bufs[l - 1][i] for i in range(NF)]

            # Phase-decomposed stride-2 transposed conv: per fold-plane, gather the 4 taps
            # x(r,c), x(r,c+1), x(r+1,c), x(r+1,c+1) from neighbouring planes / masked shifts.
            col_blocks = []
            for py in range(P):
                for px in range(P):
                    t00 = planes[py * P + px]
                    if px + 1 < P:
                        t01 = planes[py * P + px + 1]
                    else:
                        t01 = shift_flat(planes[py * P], 1) * col_m
                    if py + 1 < P:
                        t10 = planes[(py + 1) * P + px]
                    else:
                        t10 = shift_flat(planes[px], W0) * row_m
                    if px + 1 < P and py + 1 < P:
                        t11 = planes[(py + 1) * P + px + 1]
                    elif px + 1 < P:                         # only the row wraps
                        t11 = shift_flat(planes[px + 1], W0) * row_m
                    elif py + 1 < P:                         # only the column wraps
                        t11 = shift_flat(planes[(py + 1) * P], 1) * col_m
                    else:                                    # both wrap
                        t11 = shift_flat(planes[0], W0 + 1) * dia_m
                    col_blocks.append(jnp.concatenate([t00, t01, t10, t11], axis=0))
            xmat = col_blocks[0] if NF == 1 else jnp.concatenate(col_blocks, axis=1)

            # Single MXU matmul per layer (bf16 in, f32 accumulate).  Result is already
            # channel-major / spatial-minor -> every downstream store is lane-dense.
            y = jnp.dot(w_refs[l][...], xmat,
                        preferred_element_type=jnp.float32)            # (4*cout, NF*S0)
            y = y * sc_refs[l][...] + sh_refs[l][...]   # f32 BN scale + (conv bias + BN shift)
            y = jnp.where(y > 0, y, NEG_SLOPE * y)      # LeakyReLU

            if l + 1 < n_layers:
                nb = bufs[l]                             # (4*NF, cout, S0) bf16 fold planes
                P2 = 2 * P
                for py in range(P):
                    for px in range(P):
                        fcol = (py * P + px) * S0
                        for dy in range(2):
                            for dx in range(2):
                                p = 2 * dy + dx
                                psi = (2 * py + dy) * P2 + (2 * px + dx)
                                nb[psi] = y[p * cout:(p + 1) * cout,
                                            fcol:fcol + S0].astype(nb.dtype)
            else:
                # Last layer: raw fold-plane output; de-shuffled once in the wrapper.
                o_ref[0] = y

    return kernel


def latent2img_decoder_pallas(x_nchw, params):
    """Forward pass of Latent2ImgDecoder.  Input/output are NCHW like PyTorch."""
    B, C0, H0, W0 = x_nchw.shape
    S0 = H0 * W0
    L = len(params)

    layer_dims = []
    cin = C0
    for l, p in enumerate(params):
        cout = p["w_t"].shape[0] // 4
        layer_dims.append((cin, cout, 2 ** l))
        cin = cout
    CL = layer_dims[-1][1]
    PL = 2 ** (L - 1)
    NFL = PL * PL

    # Flattened-spatial, channel-major, bf16 latent (S0 on the 128-lane axis).
    x_flat = x_nchw.reshape(B, C0, S0).astype(jnp.bfloat16)

    # 0/1 boundary masks at the base resolution (identical for every layer).
    col_idx = np.arange(S0) % W0
    row_idx = np.arange(S0) // W0
    col_m = jnp.asarray(col_idx < W0 - 1, jnp.bfloat16).reshape(1, S0)
    row_m = jnp.asarray(row_idx < H0 - 1, jnp.bfloat16).reshape(1, S0)
    dia_m = col_m * row_m

    kernel = _make_decoder_kernel(layer_dims, H0, W0)

    in_specs = [pl.BlockSpec((1, C0, S0), lambda b: (b, 0, 0)),
                pl.BlockSpec((1, S0), lambda b: (0, 0)),
                pl.BlockSpec((1, S0), lambda b: (0, 0)),
                pl.BlockSpec((1, S0), lambda b: (0, 0))]
    inputs = [x_flat, col_m, row_m, dia_m]
    for p, (ci, co, _) in zip(params, layer_dims):
        in_specs += [pl.BlockSpec((4 * co, 4 * ci), lambda b: (0, 0)),   # transposed weights
                     pl.BlockSpec((4 * co, 1), lambda b: (0, 0)),        # BN scale (f32)
                     pl.BlockSpec((4 * co, 1), lambda b: (0, 0))]        # bias + BN shift (f32)
        inputs += [p["w_t"], p["scale_packed"], p["shift_packed"]]

    # bf16 fold-plane scratch for every inter-layer activation (inputs of layers 1..L-1).
    scratch_shapes = [pltpu.VMEM((4 ** (l + 1), co, S0), jnp.bfloat16)
                      for l, (_, co, _) in enumerate(layer_dims[:-1])]

    # Explicit VMEM budget (keeps the fused single-call design inside v7x's 64 MiB).
    io_bytes = C0 * S0 * 2 + 4 * CL * NFL * S0 * 4
    io_bytes += sum(int(np.prod(a.shape)) * a.dtype.itemsize for a in inputs[1:])
    scr_bytes = sum(4 ** (l + 1) * co * S0 * 2
                    for l, (_, co, _) in enumerate(layer_dims[:-1]))
    vmem_limit = int(min(64 * 1024 * 1024,
                         max(16 * 1024 * 1024, 4 * (io_bytes + scr_bytes))))

    # TODO(synk): if B == 1 on v7x, add a second "parallel" grid axis over base-row tiles
    #             (with a 1-row halo) so both TensorCores get work.
    out_k = pl.pallas_call(
        kernel,
        out_shape=jax.ShapeDtypeStruct((B, 4 * CL, NFL * S0), jnp.float32),
        grid=(B,),
        in_specs=in_specs,
        out_specs=pl.BlockSpec((1, 4 * CL, NFL * S0), lambda b: (b, 0, 0)),
        scratch_shapes=scratch_shapes,
        compiler_params=pltpu.CompilerParams(
            dimension_semantics=("parallel",),
            vmem_limit_bytes=vmem_limit),
    )(*inputs)

    # The single pixel-shuffle, once, in the wrapper (one fused XLA transpose):
    # out_k[b, (2*dy+dx)*CL + c, ((py*PL+px)*H0 + rho)*W0 + gamma]
    #   -> out[b, c, rho*2*PL + 2*py + dy, gamma*2*PL + 2*px + dx]
    out = out_k.reshape(B, 2, 2, CL, PL, PL, H0, W0)
    out = jnp.transpose(out, (0, 3, 6, 4, 1, 7, 5, 2))
    return out.reshape(B, CL, H0 * 2 * PL, W0 * 2 * PL)


# ---------------- parameter init + packing ----------------
def _pack_layer(w_pt, bias, gamma, beta, running_mean, running_var):
    """Pack ConvTranspose2d(k=3,s=2,p=1,op=1) + BatchNorm(eval) for the fused kernel.

    Returns:
      w_t:          (4*Cout, 4*Cin) bf16; row blocks = output phases [(0,0),(0,1),(1,0),(1,1)],
                    column blocks = taps [x(r,c), x(r,c+1), x(r+1,c), x(r+1,c+1)].
      scale_packed: (4*Cout, 1) f32 BN scale (applied in the f32 epilogue, NOT folded in bf16).
      shift_packed: (4*Cout, 1) f32 conv-bias + BN shift.
    NOTE: this phase/tap packing is only valid for kernel_size=3, stride=2, padding=1,
          output_padding=1 -- the module's fixed configuration.
    """
    cin, cout = w_pt.shape[0], w_pt.shape[1]
    wf = w_pt[:, :, ::-1, ::-1]                    # wf[:, :, kh, kw] = w_pt[:, :, 2-kh, 2-kw]

    def tap(kh, kw):
        return wf[:, :, kh, kw]                    # (cin, cout)

    z = jnp.zeros((cin, cout), jnp.float32)
    col_ee = jnp.concatenate([tap(1, 1), z, z, z], axis=0)
    col_eo = jnp.concatenate([tap(1, 0), tap(1, 2), z, z], axis=0)
    col_oe = jnp.concatenate([tap(0, 1), z, tap(2, 1), z], axis=0)
    col_oo = jnp.concatenate([tap(0, 0), tap(0, 2), tap(2, 0), tap(2, 2)], axis=0)
    w_all = jnp.concatenate([col_ee, col_eo, col_oe, col_oo], axis=1)      # (4cin, 4cout)
    w_t = jnp.transpose(w_all, (1, 0)).astype(jnp.bfloat16)                # (4cout, 4cin)

    scale = gamma / jnp.sqrt(running_var + BN_EPS)                         # BN eval-mode
    shift = beta + (bias - running_mean) * scale
    scale_packed = jnp.tile(scale, 4).reshape(4 * cout, 1).astype(jnp.float32)
    shift_packed = jnp.tile(shift, 4).reshape(4 * cout, 1).astype(jnp.float32)
    return w_t, scale_packed, shift_packed


def init_params(hidden_width, key):
    """Deterministic parameter init matching the PyTorch module's shapes."""
    params = []
    for i in range(len(hidden_width) - 1):
        cin, cout = hidden_width[i], hidden_width[i + 1]
        key, k1, k2, k3, k4 = jax.random.split(key, 5)
        w_pt = 0.1 * jax.random.normal(k1, (cin, cout, 3, 3), jnp.float32)   # ConvTranspose2d.weight
        bias = 0.1 * jax.random.normal(k2, (cout,), jnp.float32)             # ConvTranspose2d.bias
        gamma = 1.0 + 0.1 * jax.random.normal(k3, (cout,), jnp.float32)      # BatchNorm2d.weight
        beta = 0.1 * jax.random.normal(k4, (cout,), jnp.float32)             # BatchNorm2d.bias
        running_mean = jnp.zeros((cout,), jnp.float32)
        running_var = jnp.ones((cout,), jnp.float32)
        w_t, scale_packed, shift_packed = _pack_layer(w_pt, bias, gamma, beta,
                                                      running_mean, running_var)
        params.append(dict(w_pt=w_pt, b=bias, gamma=gamma, beta=beta,
                           running_mean=running_mean, running_var=running_var,
                           w_t=w_t, scale_packed=scale_packed, shift_packed=shift_packed))
    return params


# ---------------- pure-JAX reference (matches torch semantics, eval-mode BN) ----------------
# TODO(synk): BatchNorm2d is implemented in eval mode (running stats); training-mode batch
#             statistics would need a cross-batch reduction pass.
def latent2img_decoder_ref(x_nchw, params):
    y = x_nchw
    for p in params:
        w_conv = jnp.transpose(p["w_pt"][:, :, ::-1, ::-1], (1, 0, 2, 3))    # OIHW, flipped
        y = jax.lax.conv_general_dilated(
            y, w_conv, window_strides=(1, 1),
            padding=[(1, 2), (1, 2)], lhs_dilation=(2, 2),
            dimension_numbers=("NCHW", "OIHW", "NCHW"))
        y = y + p["b"][None, :, None, None]
        inv = (p["gamma"] / jnp.sqrt(p["running_var"] + BN_EPS))[None, :, None, None]
        y = (y - p["running_mean"][None, :, None, None]) * inv + p["beta"][None, :, None, None]
        y = jnp.where(y > 0, y, NEG_SLOPE * y)
    return y


if __name__ == "__main__":
    hidden_width = [16, 8, 1]
    B, H, W = 2, 8, 16
    key = jax.random.PRNGKey(0)
    key, kx, kp = jax.random.split(key, 3)
    x = jax.random.normal(kx, (B, hidden_width[0], H, W), jnp.float32)   # NCHW like PyTorch
    params = init_params(hidden_width, kp)

    out = latent2img_decoder_pallas(x, params)
    out = jax.block_until_ready(out)
    n_layers = len(hidden_width) - 1
    assert out.shape == (B, hidden_width[-1], H * 2 ** n_layers, W * 2 ** n_layers), out.shape

    ref = jax.block_until_ready(latent2img_decoder_ref(x, params))
    # bf16 MXU operands / bf16 inter-layer activations (f32 accumulation + f32 BN epilogue).
    np.testing.assert_allclose(np.asarray(out), np.asarray(ref), rtol=3e-2, atol=3e-2)

    print("KERNEL_OK")
</pallas_src>

<mosaic_0001>
module attributes {stable_mosaic.version = 11 : i64} {
  func.func @kernel(%arg0: i32, %arg1: memref<1x16x128xbf16, #tpu.memory_space<vmem>>, %arg2: memref<1x128xbf16, #tpu.memory_space<vmem>>, %arg3: memref<1x128xbf16, #tpu.memory_space<vmem>>, %arg4: memref<1x128xbf16, #tpu.memory_space<vmem>>, %arg5: memref<32x64xbf16, #tpu.memory_space<vmem>>, %arg6: memref<32x1xf32, #tpu.memory_space<vmem>>, %arg7: memref<32x1xf32, #tpu.memory_space<vmem>>, %arg8: memref<4x32xbf16, #tpu.memory_space<vmem>>, %arg9: memref<4x1xf32, #tpu.memory_space<vmem>>, %arg10: memref<4x1xf32, #tpu.memory_space<vmem>>, %arg11: memref<1x4x512xf32, #tpu.memory_space<vmem>>, %arg12: memref<4x8x128xbf16, #tpu.memory_space<vmem>>) attributes {dimension_semantics = [#tpu.dimension_semantics<parallel>], iteration_bounds = array<i64: 2>, scalar_prefetch = 0 : i64, scratch_operands = 1 : i64, tpu.core_type = #tpu.core_type<tc>, window_params = [{transform_indices = @transform_0, window_bounds = array<i64: 1, 16, 128>}, {pipeline_mode = #tpu.pipeline_mode<synchronous>, transform_indices = @transform_1, window_bounds = array<i64: 1, 128>}, {pipeline_mode = #tpu.pipeline_mode<synchronous>, transform_indices = @transform_2, window_bounds = array<i64: 1, 128>}, {pipeline_mode = #tpu.pipeline_mode<synchronous>, transform_indices = @transform_3, window_bounds = array<i64: 1, 128>}, {pipeline_mode = #tpu.pipeline_mode<synchronous>, transform_indices = @transform_4, window_bounds = array<i64: 32, 64>}, {pipeline_mode = #tpu.pipeline_mode<synchronous>, transform_indices = @transform_5, window_bounds = array<i64: 32, 1>}, {pipeline_mode = #tpu.pipeline_mode<synchronous>, transform_indices = @transform_6, window_bounds = array<i64: 32, 1>}, {pipeline_mode = #tpu.pipeline_mode<synchronous>, transform_indices = @transform_7, window_bounds = array<i64: 4, 32>}, {pipeline_mode = #tpu.pipeline_mode<synchronous>, transform_indices = @transform_8, window_bounds = array<i64: 4, 1>}, {pipeline_mode = #tpu.pipeline_mode<synchronous>, transform_indices = @transform_9, window_bounds = array<i64: 4, 1>}, {transform_indices = @transform_10, window_bounds = array<i64: 1, 4, 512>}]} {
    %c0 = arith.constant 0 : index
    %c0_0 = arith.constant 0 : index
    %0 = vector.load %arg2[%c0, %c0_0] : memref<1x128xbf16, #tpu.memory_space<vmem>>, vector<1x128xbf16>
    %c0_1 = arith.constant 0 : index
    %c0_2 = arith.constant 0 : index
    %1 = vector.load %arg3[%c0_1, %c0_2] : memref<1x128xbf16, #tpu.memory_space<vmem>>, vector<1x128xbf16>
    %c0_3 = arith.constant 0 : index
    %c0_4 = arith.constant 0 : index
    %2 = vector.load %arg4[%c0_3, %c0_4] : memref<1x128xbf16, #tpu.memory_space<vmem>>, vector<1x128xbf16>
    %c0_5 = arith.constant 0 : index
    %c0_6 = arith.constant 0 : index
    %c0_7 = arith.constant 0 : index
    %3 = vector.load %arg1[%c0_5, %c0_6, %c0_7] : memref<1x16x128xbf16, #tpu.memory_space<vmem>>, vector<1x16x128xbf16>
    %4 = vector.shape_cast %3 : vector<1x16x128xbf16> to vector<16x128xbf16>
    %5 = vector.extract_strided_slice %4 {offsets = [0, 1], sizes = [16, 127], strides = [1, 1]} : vector<16x128xbf16> to vector<16x127xbf16>
    %cst = arith.constant 0.000000e+00 : bf16
    %6 = vector.broadcast %cst : bf16 to vector<16x1xbf16>
    %7 = tpu.concatenate %5, %6 in 1 : vector<16x127xbf16>, vector<16x1xbf16> -> vector<16x128xbf16>
    %8 = vector.broadcast %0 : vector<1x128xbf16> to vector<16x128xbf16>
    %9 = arith.mulf %7, %8 : vector<16x128xbf16>
    %10 = vector.extract_strided_slice %4 {offsets = [0, 16], sizes = [16, 112], strides = [1, 1]} : vector<16x128xbf16> to vector<16x112xbf16>
    %cst_8 = arith.constant 0.000000e+00 : bf16
    %11 = vector.broadcast %cst_8 : bf16 to vector<16x16xbf16>
    %12 = tpu.concatenate %10, %11 in 1 : vector<16x112xbf16>, vector<16x16xbf16> -> vector<16x128xbf16>
    %13 = vector.broadcast %1 : vector<1x128xbf16> to vector<16x128xbf16>
    %14 = arith.mulf %12, %13 : vector<16x128xbf16>
    %15 = vector.extract_strided_slice %4 {offsets = [0, 17], sizes = [16, 111], strides = [1, 1]} : vector<16x128xbf16> to vector<16x111xbf16>
    %cst_9 = arith.constant 0.000000e+00 : bf16
    %16 = vector.broadcast %cst_9 : bf16 to vector<16x17xbf16>
    %17 = tpu.concatenate %15, %16 in 1 : vector<16x111xbf16>, vector<16x17xbf16> -> vector<16x128xbf16>
    %18 = vector.broadcast %2 : vector<1x128xbf16> to vector<16x128xbf16>
    %19 = arith.mulf %17, %18 : vector<16x128xbf16>
    %20 = tpu.concatenate %4, %9, %14, %19 in 0 : vector<16x128xbf16>, vector<16x128xbf16>, vector<16x128xbf16>, vector<16x128xbf16> -> vector<64x128xbf16>
    %c0_10 = arith.constant 0 : index
    %c0_11 = arith.constant 0 : index
    %21 = vector.load %arg5[%c0_10, %c0_11] : memref<32x64xbf16, #tpu.memory_space<vmem>>, vector<32x64xbf16>
    %cst_12 = arith.constant dense<0.000000e+00> : vector<32x128xf32>
    %22 = tpu.matmul %21, %20, %cst_12 {dimension_numbers = #tpu.dot_dimension_numbers<[1], [0], [0], [1], [0, 0, 1, 1], [], []>} : vector<32x64xbf16>, vector<64x128xbf16>, vector<32x128xf32> -> vector<32x128xf32>
    %c0_13 = arith.constant 0 : index
    %c0_14 = arith.constant 0 : index
    %23 = vector.load %arg6[%c0_13, %c0_14] : memref<32x1xf32, #tpu.memory_space<vmem>>, vector<32x1xf32>
    %24 = vector.broadcast %23 : vector<32x1xf32> to vector<32x128xf32>
    %25 = arith.mulf %22, %24 : vector<32x128xf32>
    %c0_15 = arith.constant 0 : index
    %c0_16 = arith.constant 0 : index
    %26 = vector.load %arg7[%c0_15, %c0_16] : memref<32x1xf32, #tpu.memory_space<vmem>>, vector<32x1xf32>
    %27 = vector.broadcast %26 : vector<32x1xf32> to vector<32x128xf32>
    %28 = arith.addf %25, %27 : vector<32x128xf32>
    %cst_17 = arith.constant 0.000000e+00 : f32
    %29 = vector.broadcast %cst_17 : f32 to vector<32x128xf32>
    %30 = arith.cmpf ogt, %28, %29 : vector<32x128xf32>
    %cst_18 = arith.constant 0.00999999977 : f32
    %31 = vector.broadcast %cst_18 : f32 to vector<32x128xf32>
    %32 = arith.mulf %31, %28 : vector<32x128xf32>
    %33 = arith.select %30, %28, %32 : vector<32x128xi1>, vector<32x128xf32>
    %34 = vector.extract_strided_slice %33 {offsets = [0, 0], sizes = [8, 128], strides = [1, 1]} : vector<32x128xf32> to vector<8x128xf32>
    %35 = arith.truncf %34 : vector<8x128xf32> to vector<8x128xbf16>
    %c0_19 = arith.constant 0 : index
    %c0_20 = arith.constant 0 : index
    %c0_21 = arith.constant 0 : index
    %36 = vector.load %arg12[%c0_19, %c0_20, %c0_21] : memref<4x8x128xbf16, #tpu.memory_space<vmem>>, vector<1x8x128xbf16>
    %37 = vector.shape_cast %36 : vector<1x8x128xbf16> to vector<8x128xbf16>
    %38 = vector.shape_cast %35 : vector<8x128xbf16> to vector<1x8x128xbf16>
    tpu.vector_store %arg12[%c0_19, %c0_20, %c0_21], %38 {strides = array<i32>} : memref<4x8x128xbf16, #tpu.memory_space<vmem>>, vector<1x8x128xbf16>,
    %39 = vector.extract_strided_slice %33 {offsets = [8, 0], sizes = [8, 128], strides = [1, 1]} : vector<32x128xf32> to vector<8x128xf32>
    %40 = arith.truncf %39 : vector<8x128xf32> to vector<8x128xbf16>
    %c1 = arith.constant 1 : index
    %c0_22 = arith.constant 0 : index
    %c0_23 = arith.constant 0 : index
    %41 = vector.load %arg12[%c1, %c0_22, %c0_23] : memref<4x8x128xbf16, #tpu.memory_space<vmem>>, vector<1x8x128xbf16>
    %42 = vector.shape_cast %41 : vector<1x8x128xbf16> to vector<8x128xbf16>
    %43 = vector.shape_cast %40 : vector<8x128xbf16> to vector<1x8x128xbf16>
    tpu.vector_store %arg12[%c1, %c0_22, %c0_23], %43 {strides = array<i32>} : memref<4x8x128xbf16, #tpu.memory_space<vmem>>, vector<1x8x128xbf16>,
    %44 = vector.extract_strided_slice %33 {offsets = [16, 0], sizes = [8, 128], strides = [1, 1]} : vector<32x128xf32> to vector<8x128xf32>
    %45 = arith.truncf %44 : vector<8x128xf32> to vector<8x128xbf16>
    %c2 = arith.constant 2 : index
    %c0_24 = arith.constant 0 : index
    %c0_25 = arith.constant 0 : index
    %46 = vector.load %arg12[%c2, %c0_24, %c0_25] : memref<4x8x128xbf16, #tpu.memory_space<vmem>>, vector<1x8x128xbf16>
    %47 = vector.shape_cast %46 : vector<1x8x128xbf16> to vector<8x128xbf16>
    %48 = vector.shape_cast %45 : vector<8x128xbf16> to vector<1x8x128xbf16>
    tpu.vector_store %arg12[%c2, %c0_24, %c0_25], %48 {strides = array<i32>} : memref<4x8x128xbf16, #tpu.memory_space<vmem>>, vector<1x8x128xbf16>,
    %49 = vector.extract_strided_slice %33 {offsets = [24, 0], sizes = [8, 128], strides = [1, 1]} : vector<32x128xf32> to vector<8x128xf32>
    %50 = arith.truncf %49 : vector<8x128xf32> to vector<8x128xbf16>
    %c3 = arith.constant 3 : index
    %c0_26 = arith.constant 0 : index
    %c0_27 = arith.constant 0 : index
    %51 = vector.load %arg12[%c3, %c0_26, %c0_27] : memref<4x8x128xbf16, #tpu.memory_space<vmem>>, vector<1x8x128xbf16>
    %52 = vector.shape_cast %51 : vector<1x8x128xbf16> to vector<8x128xbf16>
    %53 = vector.shape_cast %50 : vector<8x128xbf16> to vector<1x8x128xbf16>
    tpu.vector_store %arg12[%c3, %c0_26, %c0_27], %53 {strides = array<i32>} : memref<4x8x128xbf16, #tpu.memory_space<vmem>>, vector<1x8x128xbf16>,
    %c0_28 = arith.constant 0 : index
    %c0_29 = arith.constant 0 : index
    %c0_30 = arith.constant 0 : index
    %54 = vector.load %arg12[%c0_28, %c0_29, %c0_30] : memref<4x8x128xbf16, #tpu.memory_space<vmem>>, vector<1x8x128xbf16>
    %55 = vector.shape_cast %54 : vector<1x8x128xbf16> to vector<8x128xbf16>
    %c1_31 = arith.constant 1 : index
    %c0_32 = arith.constant 0 : index
    %c0_33 = arith.constant 0 : index
    %56 = vector.load %arg12[%c1_31, %c0_32, %c0_33] : memref<4x8x128xbf16, #tpu.memory_space<vmem>>, vector<1x8x128xbf16>
    %57 = vector.shape_cast %56 : vector<1x8x128xbf16> to vector<8x128xbf16>
    %c2_34 = arith.constant 2 : index
    %c0_35 = arith.constant 0 : index
    %c0_36 = arith.constant 0 : index
    %58 = vector.load %arg12[%c2_34, %c0_35, %c0_36] : memref<4x8x128xbf16, #tpu.memory_space<vmem>>, vector<1x8x128xbf16>
    %59 = vector.shape_cast %58 : vector<1x8x128xbf16> to vector<8x128xbf16>
    %c3_37 = arith.constant 3 : index
    %c0_38 = arith.constant 0 : index
    %c0_39 = arith.constant 0 : index
    %60 = vector.load %arg12[%c3_37, %c0_38, %c0_39] : memref<4x8x128xbf16, #tpu.memory_space<vmem>>, vector<1x8x128xbf16>
    %61 = vector.shape_cast %60 : vector<1x8x128xbf16> to vector<8x128xbf16>
    %62 = tpu.concatenate %55, %57, %59, %61 in 0 : vector<8x128xbf16>, vector<8x128xbf16>, vector<8x128xbf16>, vector<8x128xbf16> -> vector<32x128xbf16>
    %63 = vector.extract_strided_slice %55 {offsets = [0, 1], sizes = [8, 127], strides = [1, 1]} : vector<8x128xbf16> to vector<8x127xbf16>
    %cst_40 = arith.constant 0.000000e+00 : bf16
    %64 = vector.broadcast %cst_40 : bf16 to vector<8x1xbf16>
    %65 = tpu.concatenate %63, %64 in 1 : vector<8x127xbf16>, vector<8x1xbf16> -> vector<8x128xbf16>
    %66 = vector.broadcast %0 : vector<1x128xbf16> to vector<8x128xbf16>
    %67 = arith.mulf %65, %66 : vector<8x128xbf16>
    %68 = vector.extract_strided_slice %59 {offsets = [0, 1], sizes = [8, 127], strides = [1, 1]} : vector<8x128xbf16> to vector<8x127xbf16>
    %cst_41 = arith.constant 0.000000e+00 : bf16
    %69 = vector.broadcast %cst_41 : bf16 to vector<8x1xbf16>
    %70 = tpu.concatenate %68, %69 in 1 : vector<8x127xbf16>, vector<8x1xbf16> -> vector<8x128xbf16>
    %71 = vector.broadcast %0 : vector<1x128xbf16> to vector<8x128xbf16>
    %72 = arith.mulf %70, %71 : vector<8x128xbf16>
    %73 = tpu.concatenate %57, %67, %61, %72 in 0 : vector<8x128xbf16>, vector<8x128xbf16>, vector<8x128xbf16>, vector<8x128xbf16> -> vector<32x128xbf16>
    %74 = vector.extract_strided_slice %55 {offsets = [0, 16], sizes = [8, 112], strides = [1, 1]} : vector<8x128xbf16> to vector<8x112xbf16>
    %cst_42 = arith.constant 0.000000e+00 : bf16
    %75 = vector.broadcast %cst_42 : bf16 to vector<8x16xbf16>
    %76 = tpu.concatenate %74, %75 in 1 : vector<8x112xbf16>, vector<8x16xbf16> -> vector<8x128xbf16>
    %77 = vector.broadcast %1 : vector<1x128xbf16> to vector<8x128xbf16>
    %78 = arith.mulf %76, %77 : vector<8x128xbf16>
    %79 = vector.extract_strided_slice %57 {offsets = [0, 16], sizes = [8, 112], strides = [1, 1]} : vector<8x128xbf16> to vector<8x112xbf16>
    %cst_43 = arith.constant 0.000000e+00 : bf16
    %80 = vector.broadcast %cst_43 : bf16 to vector<8x16xbf16>
    %81 = tpu.concatenate %79, %80 in 1 : vector<8x112xbf16>, vector<8x16xbf16> -> vector<8x128xbf16>
    %82 = vector.broadcast %1 : vector<1x128xbf16> to vector<8x128xbf16>
    %83 = arith.mulf %81, %82 : vector<8x128xbf16>
    %84 = tpu.concatenate %59, %61, %78, %83 in 0 : vector<8x128xbf16>, vector<8x128xbf16>, vector<8x128xbf16>, vector<8x128xbf16> -> vector<32x128xbf16>
    %85 = vector.extract_strided_slice %59 {offsets = [0, 1], sizes = [8, 127], strides = [1, 1]} : vector<8x128xbf16> to vector<8x127xbf16>
    %cst_44 = arith.constant 0.000000e+00 : bf16
    %86 = vector.broadcast %cst_44 : bf16 to vector<8x1xbf16>
    %87 = tpu.concatenate %85, %86 in 1 : vector<8x127xbf16>, vector<8x1xbf16> -> vector<8x128xbf16>
    %88 = vector.broadcast %0 : vector<1x128xbf16> to vector<8x128xbf16>
    %89 = arith.mulf %87, %88 : vector<8x128xbf16>
    %90 = vector.extract_strided_slice %57 {offsets = [0, 16], sizes = [8, 112], strides = [1, 1]} : vector<8x128xbf16> to vector<8x112xbf16>
    %cst_45 = arith.constant 0.000000e+00 : bf16
    %91 = vector.broadcast %cst_45 : bf16 to vector<8x16xbf16>
    %92 = tpu.concatenate %90, %91 in 1 : vector<8x112xbf16>, vector<8x16xbf16> -> vector<8x128xbf16>
    %93 = vector.broadcast %1 : vector<1x128xbf16> to vector<8x128xbf16>
    %94 = arith.mulf %92, %93 : vector<8x128xbf16>
    %95 = vector.extract_strided_slice %55 {offsets = [0, 17], sizes = [8, 111], strides = [1, 1]} : vector<8x128xbf16> to vector<8x111xbf16>
    %cst_46 = arith.constant 0.000000e+00 : bf16
    %96 = vector.broadcast %cst_46 : bf16 to vector<8x17xbf16>
    %97 = tpu.concatenate %95, %96 in 1 : vector<8x111xbf16>, vector<8x17xbf16> -> vector<8x128xbf16>
    %98 = vector.broadcast %2 : vector<1x128xbf16> to vector<8x128xbf16>
    %99 = arith.mulf %97, %98 : vector<8x128xbf16>
    %100 = tpu.concatenate %61, %89, %94, %99 in 0 : vector<8x128xbf16>, vector<8x128xbf16>, vector<8x128xbf16>, vector<8x128xbf16> -> vector<32x128xbf16>
    %101 = tpu.concatenate %62, %73, %84, %100 in 1 : vector<32x128xbf16>, vector<32x128xbf16>, vector<32x128xbf16>, vector<32x128xbf16> -> vector<32x512xbf16>
    %c0_47 = arith.constant 0 : index
    %c0_48 = arith.constant 0 : index
    %102 = vector.load %arg8[%c0_47, %c0_48] : memref<4x32xbf16, #tpu.memory_space<vmem>>, vector<4x32xbf16>
    %cst_49 = arith.constant dense<0.000000e+00> : vector<4x512xf32>
    %103 = tpu.matmul %102, %101, %cst_49 {dimension_numbers = #tpu.dot_dimension_numbers<[1], [0], [0], [1], [0, 0, 1, 1], [], []>} : vector<4x32xbf16>, vector<32x512xbf16>, vector<4x512xf32> -> vector<4x512xf32>
    %c0_50 = arith.constant 0 : index
    %c0_51 = arith.constant 0 : index
    %104 = vector.load %arg9[%c0_50, %c0_51] : memref<4x1xf32, #tpu.memory_space<vmem>>, vector<4x1xf32>
    %105 = vector.broadcast %104 : vector<4x1xf32> to vector<4x512xf32>
    %106 = arith.mulf %103, %105 : vector<4x512xf32>
    %c0_52 = arith.constant 0 : index
    %c0_53 = arith.constant 0 : index
    %107 = vector.load %arg10[%c0_52, %c0_53] : memref<4x1xf32, #tpu.memory_space<vmem>>, vector<4x1xf32>
    %108 = vector.broadcast %107 : vector<4x1xf32> to vector<4x512xf32>
    %109 = arith.addf %106, %108 : vector<4x512xf32>
    %cst_54 = arith.constant 0.000000e+00 : f32
    %110 = vector.broadcast %cst_54 : f32 to vector<4x512xf32>
    %111 = arith.cmpf ogt, %109, %110 : vector<4x512xf32>
    %cst_55 = arith.constant 0.00999999977 : f32
    %112 = vector.broadcast %cst_55 : f32 to vector<4x512xf32>
    %113 = arith.mulf %112, %109 : vector<4x512xf32>
    %114 = arith.select %111, %109, %113 : vector<4x512xi1>, vector<4x512xf32>
    %c0_56 = arith.constant 0 : index
    %c0_57 = arith.constant 0 : index
    %c0_58 = arith.constant 0 : index
    %115 = vector.load %arg11[%c0_56, %c0_57, %c0_58] : memref<1x4x512xf32, #tpu.memory_space<vmem>>, vector<1x4x512xf32>
    %116 = vector.shape_cast %115 : vector<1x4x512xf32> to vector<4x512xf32>
    %117 = vector.shape_cast %114 : vector<4x512xf32> to vector<1x4x512xf32>
    tpu.vector_store %arg11[%c0_56, %c0_57, %c0_58], %117 {strides = array<i32>} : memref<1x4x512xf32, #tpu.memory_space<vmem>>, vector<1x4x512xf32>,
    return
  }
  func.func @transform_0(%arg0: i32) -> (i32, i32, i32) {
    %c0_i32 = arith.constant 0 : i32
    %c0_i32_0 = arith.constant 0 : i32
    %c0_i32_1 = arith.constant 0 : i32
    return %arg0, %c0_i32, %c0_i32_0 : i32, i32, i32
  }
  func.func @transform_1(%arg0: i32) -> (i32, i32) {
    %c0_i32 = arith.constant 0 : i32
    %c0_i32_0 = arith.constant 0 : i32
    %c0_i32_1 = arith.constant 0 : i32
    return %c0_i32, %c0_i32_0 : i32, i32
  }
  func.func @transform_2(%arg0: i32) -> (i32, i32) {
    %c0_i32 = arith.constant 0 : i32
    %c0_i32_0 = arith.constant 0 : i32
    %c0_i32_1 = arith.constant 0 : i32
    return %c0_i32, %c0_i32_0 : i32, i32
  }
  func.func @transform_3(%arg0: i32) -> (i32, i32) {
    %c0_i32 = arith.constant 0 : i32
    %c0_i32_0 = arith.constant 0 : i32
    %c0_i32_1 = arith.constant 0 : i32
    return %c0_i32, %c0_i32_0 : i32, i32
  }
  func.func @transform_4(%arg0: i32) -> (i32, i32) {
    %c0_i32 = arith.constant 0 : i32
    %c0_i32_0 = arith.constant 0 : i32
    %c0_i32_1 = arith.constant 0 : i32
    return %c0_i32, %c0_i32_0 : i32, i32
  }
  func.func @transform_5(%arg0: i32) -> (i32, i32) {
    %c0_i32 = arith.constant 0 : i32
    %c0_i32_0 = arith.constant 0 : i32
    %c0_i32_1 = arith.constant 0 : i32
    return %c0_i32, %c0_i32_0 : i32, i32
  }
  func.func @transform_6(%arg0: i32) -> (i32, i32) {
    %c0_i32 = arith.constant 0 : i32
    %c0_i32_0 = arith.constant 0 : i32
    %c0_i32_1 = arith.constant 0 : i32
    return %c0_i32, %c0_i32_0 : i32, i32
  }
  func.func @transform_7(%arg0: i32) -> (i32, i32) {
    %c0_i32 = arith.constant 0 : i32
    %c0_i32_0 = arith.constant 0 : i32
    %c0_i32_1 = arith.constant 0 : i32
    return %c0_i32, %c0_i32_0 : i32, i32
  }
  func.func @transform_8(%arg0: i32) -> (i32, i32) {
    %c0_i32 = arith.constant 0 : i32
    %c0_i32_0 = arith.constant 0 : i32
    %c0_i32_1 = arith.constant 0 : i32
    return %c0_i32, %c0_i32_0 : i32, i32
  }
  func.func @transform_9(%arg0: i32) -> (i32, i32) {
    %c0_i32 = arith.constant 0 : i32
    %c0_i32_0 = arith.constant 0 : i32
    %c0_i32_1 = arith.constant 0 : i32
    return %c0_i32, %c0_i32_0 : i32, i32
  }
  func.func @transform_10(%arg0: i32) -> (i32, i32, i32) {
    %c0_i32 = arith.constant 0 : i32
    %c0_i32_0 = arith.constant 0 : i32
    %c0_i32_1 = arith.constant 0 : i32
    return %arg0, %c0_i32, %c0_i32_0 : i32, i32, i32
  }
}

</mosaic_0001>

<bundles_post_ra>
// kernel: tpu_custom_call.1
= control target key start
LH: loop header
LB: loop body
LE: loop exit
PB: predicated region body
PF: predicated region fallthrough
CT: control target
= control target key end

     0   :  { %15 = vsyncpa [#allocation4], 0  ;;  %s1267_s0 = inlined_call_operand.vmem [shape: bf16[2,16,128], index: 0, kind: input, shape index: {}]   ;;  %s1268_s1 = inlined_call_operand.vmem [shape: bf16[1,128], index: 1, kind: input, shape index: {}]   ;;  %s1269_s2 = inlined_call_operand.vmem [shape: bf16[1,128], index: 2, kind: input, shape index: {}]   ;;  %s1270_s3 = inlined_call_operand.vmem [shape: bf16[1,128], index: 3, kind: input, shape index: {}]   ;;  %s1271_s4 = inlined_call_operand.vmem [shape: bf16[32,64], index: 4, kind: input, shape index: {}]   ;;  %s1272_s5 = inlined_call_operand.vmem [shape: f32[32,1], index: 5, kind: input, shape index: {}]   ;;  %s1273_s6 = inlined_call_operand.vmem [shape: f32[32,1], index: 6, kind: input, shape index: {}]   ;;  %s1274_s7 = inlined_call_operand.vmem [shape: bf16[4,32], index: 7, kind: input, shape index: {}]   ;;  %s1275_s8 = inlined_call_operand.vmem [shape: f32[4,1], index: 8, kind: input, shape index: {}]   ;;  %s1276_s9 = inlined_call_operand.vmem [shape: f32[4,1], index: 9, kind: input, shape index: {}]   ;;  %s1277_s10 = inlined_call_operand.hbm [shape: f32[2,4,512], index: 10, kind: output, shape index: {}]  }
   0x1   :  { %17 = vsyncpa [#allocation4 + $0x1], 0  ;;  %s1073_s13 = smov 0   ;;  %s1075_s14 = smov 0  }
   0x2   :  { %s1077_s15 = smov 0   ;;  %s1079_s16 = smov 0  }
   0x3 LB: > { %s1094_s17 = sadd.s32 4294967295, %s1011_s16   ;;  %s844_s18 = sadd.s32 4294967294, %s1011_s16   ;;  %s1011_s16 = sphi %s1079_s16, %s1288_s16   ;;  %s1007_s15 = sphi %s1077_s15, %s1287_s15   ;;  %s1003_s14 = sphi %s1075_s14, %s1286_s14   ;;  %s999_s13 = sphi %s1073_s13, %s1285_s13  }
   0x4   : > { %s1098_s19 = sadd.s32 1, %s1011_s16   ;;  %s245_s20 = sadd.s32 1, %s1007_s15 }
   0x5   : > { %s242_s21 = ssub.s32 %s1011_s16, %s1098_s19  ;;  %p255_p0 = scmp.ne.s32.totalorder %s1007_s15, %s1003_s14 }
   0x6   : > { %p243_p1 = scmp.eq.s32.totalorder %s242_s21, 0  ;;  %p256_p2 = scmp.eq.s32.totalorder %s1094_s17, 1 }
   0x7   : > { %p261_p3 = scmp.ne.s32.totalorder %s1003_s14, %s999_s13  ;;  %p262_p4 = scmp.eq.s32.totalorder %s844_s18, 1 }
   0x8   : > { %s1109_s22 = scalar_select %p243_p1, %s1007_s15, %s245_s20  }
   0x9   : > { %p1111_p5 = por %p256_p2, %p255_p0  ;;  %p1115_p6 = por %p262_p4, %p261_p3 }
   0xa   : > { %p847_p7 = scmp.ge.s32.totalorder %s1011_s16, 1  ;;  %p315_p8 = scmp.lt.s32.totalorder %s1011_s16, 3 }
   0xc   : > { %p316_p9 = pnand %p847_p7, %p315_p8 }
   0xd   : > { %p353_p10 = scmp.lt.s32.totalorder (!%p316_p9), %s1094_s17, 1  ;;  %v943_v1 = vld [vmem:[%s1271_s4] sm:$0xff] (!%p316_p9)   ;;  %vm427_vm0 = vcmask (!%p316_p9), 523264   ;;  %s1013_s12 = smov (!%p316_p9), 127   ;;  %v1015_v3 = vmov (!%p316_p9), 0   ;;  %v484_v5 = vld [vmem:[%s1272_s5 + $0x8] sm:$0xff] (!%p316_p9)  ;;  %v379_v11 = vlaneseq (!%p316_p9) }
   0xe   : > { %319 = sbr.rel (%p316_p9) target bundleno = 763 (0x2fb), region = 60  ;;  %s1278_s18 = smov (!%p316_p9), 111   ;;  %893 = vmatprep.mubr.msk.bf16.mxu0 (!%p316_p9), %vm427_vm0, %v943_v1  ;;  %v483_v2 = vld [vmem:[%s1272_s5] sm:$0xff] (!%p316_p9)  ;;  %940 = vset.pattern.permute.xlu1 (!%p316_p9), %v1015_v3  ;;  %v512_v6 = vld [vmem:[%s1273_s6 + $0x8] sm:$0xff] (!%p316_p9)  ;;  %v485_v7 = vld [vmem:[%s1272_s5 + $0x10] sm:$0xff] (!%p316_p9)  ;;  %vm371_vm1 = vcmask (!%p316_p9), 1039360  }
   0xf   : > { %941 = vset.pattern.permute.xlu0 (!%p316_p9), %v1015_v3  ;;  %v511_v4 = vld [vmem:[%s1273_s6] sm:$0xff] (!%p316_p9)  ;;  %678 = vmatprep.mubr.bf16.mxu1 (!%p316_p9), %v1015_v3  ;;  %v486_v8 = vld [vmem:[%s1272_s5 + $0x18] sm:$0xff] (!%p316_p9)  ;;  %v513_v9 = vld [vmem:[%s1273_s6 + $0x10] sm:$0xff] (!%p316_p9)  ;;  %v380_v12 = vshrl.u32 (!%p316_p9), %v379_v11, 7  ;;  %vm400_vm2 = vcmask (!%p316_p9), 908288   ;;  %vm386_vm3 = vcmask (!%p316_p9), 916480  }
  0x10   : > { %v514_v10 = vld [vmem:[%s1273_s6 + $0x18] sm:$0xff] (!%p316_p9)  ;;  %v359_v13 = vld [vmem:[%s1268_s1] sm:$0x1] (!%p316_p9)  ;;  %v944_v32 = vld [vmem:[%s1271_s4 + $0x8] sm:$0xff] (!%p316_p9)   ;;  %vm572_vm8 = vcmask (!%p316_p9), 1043456   ;;  %s1283_s28 = smov (!%p316_p9), 112  }
  0x11   : > { %v377_v14 = vpack.i.b16 (!%p316_p9), %v359_v13, %v359_v13  ;;  %v381_v15 = vsub.s32 (!%p316_p9), 0, %v380_v12  ;;  %v360_v16 = vld [vmem:[%s1269_s2] sm:$0x1] (!%p316_p9)  ;;  %vm642_vm9 = vcmask (!%p316_p9), 261120   ;;  %s350_s27 = sand.u32 (!%p316_p9), 1, %s1003_s14  }
  0x12   : > { %v361_v17 = vld [vmem:[%s1270_s3] sm:$0x1] (!%p316_p9)  ;;  %v391_v19 = vpack.i.b16 (!%p316_p9), %v360_v16, %v360_v16  ;;  %s771_s21 = scalar_lea.sflag (!%p316_p9), [#allocation4], %s350_s27 }
  0x13   : > { %v1169_v18 = vrot.slane (!%p316_p9), %v377_v14, %v381_v15  ;;  %v405_v20 = vpack.i.b16 (!%p316_p9), %v361_v17, %v361_v17 }
  0x14   : > { %v1173_v25 = vrot.slane (!%p316_p9), %v391_v19, %v381_v15 }
  0x15   : > { %s354_s25 = scalar_select %p353_p10, %s1094_s17, 1  ;;  %v1175_v26 = vrot.slane %v405_v20, %v381_v15 }
  0x17   : > { %s867_s26 = sshll.u32 %s354_s25, 3  ;;  %s1279_s25 = smov 112  }
  0x18   : > { %s357_s29 = scalar_lea.vmem %s1267_s0, %s867_s26 }
  0x19   : > { %v942_v0 = vld [vmem:[%s357_s29] sm:$0xff]   ;;  %s1284_s29 = smov 111  }
  0x1a   : > { %369 = vrot.lane.b32.xlu0 %v942_v0, %s1013_s12  ;;  %398 = vrot.lane.b32.xlu1 %v942_v0, %s1278_s18  ;;  %s848_s18 = sshll.u32 %s350_s27, 4 }
  0x1b   : > { %885 = vmatprep.subr.bf16.mxu0 %v942_v0 }
  0x1c   : > { %886 = vmatpush3.bf16.msra.mxu0 %v942_v0 }
  0x1e   : > { %384 = vrot.lane.b32.xlu0 %v942_v0, %s1279_s25  ;;  %489 = vperm.xlu1 %940, %v483_v2   ;;  %s352_s25 = scalar_lea.vmem [#allocation3], %s848_s18 }
  0x22   : > { %517 = vperm.xlu1 %940, %v511_v4   ;;  %494 = vperm.xlu0 %941, %v484_v5  }
  0x26   : > { %522 = vperm.xlu1 %940, %v512_v6   ;;  %499 = vperm.xlu0 %941, %v485_v7   ;;  %v728_v7 = vld [vmem:[%s1275_s8] sm:$0xf] }
  0x2a   : > { %504 = vperm.xlu1 %940, %v486_v8   ;;  %527 = vperm.xlu0 %941, %v513_v9   ;;  %v738_v8 = vld [vmem:[%s1276_s9] sm:$0xf] }
  0x2e   : > { %532 = vperm.xlu1 %940, %v514_v10  }
  0x8c   : > { %v370_v21 = vpop.permute.xlu0 %369  ;;  %v399_v22 = vpop.permute.xlu1 %398 }
  0x8d   : > { %v374_v23 = vsel %vm371_vm1, %v370_v21, 0  ;;  %v402_v27 = vsel %vm400_vm2, %v399_v22, 0 }
  0x8e   : > { %v383_v24 = vmul.bf16 %v1169_v18, %v374_v23  ;;  %v411_v31 = vmul.bf16 %v1175_v26, %v402_v27 }
  0x90   : > { %v385_v28 = vpop.permute.xlu0 %384  ;;  %887 = vmatprep.subr.bf16.mxu0 %v383_v24 }
  0x91   : > { %v388_v29 = vsel %vm386_vm3, %v385_v28, 0  ;;  %888 = vmatpush3.bf16.msra.mxu0 %v383_v24 }
  0x92   : > { %v397_v30 = vmul.bf16 %v1173_v25, %v388_v29 }
  0x94   : > { %889 = vmatprep.subr.bf16.mxu0 %v397_v30 }
  0x95   : > { %890 = vmatpush3.bf16.msra.mxu0 %v397_v30 }
  0x96   : > { %891 = vmatprep.subr.bf16.mxu0 %v411_v31 }
  0x99   : > { %892 = vmatpush3.bf16.msra.mxu0 %v411_v31 }
  0x9c   : > { %894 = vmatmul.mubr.msk.bf16.vlgmr.msra.gmra.mrb[0].mxu0 %vm427_vm0, %v944_v32  ;;  %v641_v32 = vld [vmem:[%s1274_s7] sm:$0x3] }
  0x9d   : > { %v490_v33 = vpop.permute.xlu1 %489 }
  0xa1   : > { %v518_v34 = vpop.permute.xlu1 %517  ;;  %v495_v35 = vpop.permute.xlu0 %494 }
  0xa5   : > { %v523_v36 = vpop.permute.xlu1 %522  ;;  %v500_v37 = vpop.permute.xlu0 %499 }
  0xa9   : > { %v505_v38 = vpop.permute.xlu1 %504  ;;  %v528_v40 = vpop.permute.xlu0 %527 }
  0xad   : > { %v533_v48 = vpop.permute.xlu1 %532 }
 0x16f   : > { %v895_v39 = vpop.f32.mrb[0].mxu0 }
 0x170   : > { %v509_v41 = vmul.f32 %v895_v39, %v500_v37  ;;  %v468_v42 = vpop.f32.mrb[1].mxu0 }
 0x171   : > { %v507_v43 = vmul.f32 %v490_v33, %v468_v42  ;;  %v896_v44 = vpop.f32.mrb[2].mxu0 }
 0x172   : > { %v537_v45 = vadd.f32 %v528_v40, %v509_v41  ;;  %v510_v46 = vmul.f32 %v896_v44, %v505_v38  ;;  %v471_v47 = vpop.f32.mrb[3].mxu0 }
 0x173   : > { %v535_v49 = vadd.f32 %v518_v34, %v507_v43  ;;  %v508_v50 = vmul.f32 %v495_v35, %v471_v47 }
 0x174   : > { %v545_v51 = vmul.f32 0.01, %v537_v45  ;;  %v538_v52 = vadd.f32 %v533_v48, %v510_v46  ;;  %vm541_vm4 = vcmp.gt.f32.partialorder %v537_v45, 0.0 }
 0x175   : > { %v543_v53 = vmul.f32 0.01, %v535_v49  ;;  %v536_v54 = vadd.f32 %v523_v36, %v508_v50  ;;  %vm539_vm5 = vcmp.gt.f32.partialorder %v535_v49, 0.0 }
 0x176   : > { %vm542_vm6 = vcmp.gt.f32.partialorder %v538_v52, 0.0  ;;  %v546_v55 = vmul.f32 0.01, %v538_v52  ;;  %v549_v57 = vsel %vm541_vm4, %v537_v45, %v545_v51 }
 0x177   : > { %vm540_vm7 = vcmp.gt.f32.partialorder %v536_v54, 0.0  ;;  %v544_v56 = vmul.f32 0.01, %v536_v54  ;;  %v547_v59 = vsel %vm539_vm5, %v535_v49, %v543_v53 }
 0x178   : > { %v550_v58 = vsel %vm542_vm6, %v538_v52, %v546_v55 }
 0x179   : > { %v877_v60 = vpack.c.bf16 %v550_v58, %v549_v57  ;;  %v548_v61 = vsel %vm540_vm7, %v536_v54, %v544_v56 }
 0x17a   : > { %v872_v62 = vpack.c.bf16 %v548_v61, %v547_v59 }
 0x17b   : > { %878 = vst [vmem:[#allocation2 + $0x8] sm:$0xff] %v877_v60  }
 0x17c   : > { %873 = vst [vmem:[#allocation2] sm:$0xff] %v872_v62  }
 0x182   : > { %v564_v63 = vld [vmem:[#allocation2 + $0x8] sm:$0xf]  ;;  %v565_v19 = vld [vmem:[#allocation2 + $0xc] sm:$0xf] }
 0x183   : > { %v859_v0 = vcombine.low %v564_v63, %v564_v63  ;;  %v562_v1 = vld [vmem:[#allocation2] sm:$0xf]  ;;  %v563_v2 = vld [vmem:[#allocation2 + $0x4] sm:$0xf]  ;;  %v857_v23 = vcombine.low %v565_v19, %v565_v19 }
 0x184   : > { %v858_v4 = vcombine.low %v562_v1, %v562_v1  ;;  %v856_v5 = vcombine.low %v563_v2, %v563_v2 }
 0x185   : > { %593 = vrot.lane.b32.xlu1 %v859_v0, %s1013_s12  ;;  %v579_v29 = vsel %vm572_vm8, %v564_v63, %v857_v23 }
 0x186   : > { %584 = vrot.lane.b32.xlu0 %v858_v4, %s1013_s12  ;;  %v575_v6 = vsel %vm572_vm8, %v562_v1, %v856_v5 }
 0x189   : > { %617 = vrot.lane.b32.xlu1 %v856_v5, %s1283_s28 }
 0x18a   : > { %629 = vrot.lane.b32.xlu0 %v858_v4, %s1284_s29  ;;  %s785_s29 = sshll.u32 %s352_s25, 4  ;;  %s1225_s29 = int_to_ptr.vmem [resolvable:$true] %s785_s29 }
 0x18b   : > { %s949_s12 = scalar_lea.vmem %s1225_s29, 256 }
 0x18c   : > { %p950_p11 = scmp.ne.s32.totalorder %s1225_s29, %s949_s12 }
 0x18d   : > { %731 = vperm.xlu1 %940, %v728_v7  }
 0x18e   : > { %611 = vrot.lane.b32.xlu0 %v858_v4, %s1283_s28  ;;  %s868_s28 = sshll.u32 %s1094_s17, 8  ;;  %p951_p12 = pnand %p950_p11, %p1111_p5 }
 0x18f   : > { %s1223_s20 = scalar_lea.hbm %s1277_s10, %s868_s28  ;;  %s1017_s17 = smov [#allocation3]  }
 0x190   : > { %p952_p13 = pneg %p951_p12  ;;  %s953_s26 = sshll.u32 %s1017_s17, 4  ;;  %s954_s26 = int_to_ptr.vmem [resolvable:$false] %s953_s26 }
 0x191   : > { %s955_s18 = scalar_lea.vmem %s954_s26, 512  ;;  %p956_p0 = scmp.lt.s32.totalorder %s1225_s29, %s954_s26 }
 0x192   : > { %741 = vperm.xlu0 %941, %v738_v8   ;;  %p957_p1 = scmp.lt.s32.totalorder %s955_s18, %s949_s12 }
 0x194   : > { %p958_p2 = por %p957_p1, %p956_p0 }
 0x196   : > { %p959_p3 = pnand %p958_p2, %p952_p13 }
 0x1f7   : > { %v594_v9 = vpop.permute.xlu1 %593 }
 0x1f8   : > { %v596_v10 = vsel %vm371_vm1, %v594_v9, 0  ;;  %v585_v11 = vpop.permute.xlu0 %584 }
 0x1f9   : > { %v598_v12 = vmul.bf16 %v596_v10, %v1169_v18  ;;  %v587_v13 = vsel %vm371_vm1, %v585_v11, 0 }
 0x1fa   : > { %v589_v14 = vmul.bf16 %v587_v13, %v1169_v18 }
 0x1fb   : > { %v602_v15 = vrot.slane %v598_v12, 4  ;;  %v618_v22 = vpop.permute.xlu1 %617 }
 0x1fc   : > { %v600_v16 = vrot.slane %v589_v14, 4  ;;  %v630_v17 = vpop.permute.xlu0 %629  ;;  %v620_v18 = vsel %vm386_vm3, %v618_v22, 0 }
 0x1fd   : > { %v632_v20 = vsel %vm400_vm2, %v630_v17, 0  ;;  %v609_v27 = vsel %vm572_vm8, %v565_v19, %v602_v15 }
 0x1fe   : > { %v605_v21 = vsel %vm572_vm8, %v563_v2, %v600_v16  ;;  %v634_v24 = vmul.bf16 %v632_v20, %v1175_v26  ;;  %v622_v26 = vmul.bf16 %v620_v18, %v1173_v25 }
 0x1ff   : > { %646 = vmatprep.subr.bf16.mxu1 %v605_v21 }
 0x200   : > { %647 = vmatpush1.bf16.msra.mxu1 %v575_v6  ;;  %v612_v28 = vpop.permute.xlu0 %611  ;;  %v636_v30 = vrot.slane %v634_v24, 4  ;;  %v624_v35 = vrot.slane %v622_v26, 4 }
 0x201   : > { %648 = vmatprep.subr.bf16.mxu1 %v609_v27  ;;  %v614_v31 = vsel %vm386_vm3, %v612_v28, 0 }
 0x202   : > { %v616_v33 = vmul.bf16 %v614_v31, %v1173_v25  ;;  %v639_v34 = vsel %vm572_vm8, %v622_v26, %v636_v30 }
 0x204   : > { %649 = vmatpush1.bf16.msra.mxu1 %v579_v29  ;;  %v627_v36 = vsel %vm572_vm8, %v616_v33, %v624_v35 }
 0x205   : > { %687 = vmatprep.subr.bf16.mxu1 %v609_v27 }
 0x207   : > { %860 = vmatmul.mubr.msk.bf16.vlgmr.msra.gmra.mrb[0].mxu1 %vm642_vm9, %v641_v32 }
 0x208   : > { %688 = vmatpush1.bf16.msra.mxu1 %v579_v29  ;;  %719 = vmatprep.mubr.bf16.mxu1 %v1015_v3 }
 0x209   : > { %689 = vmatprep.subr.bf16.mxu1 %v639_v34 }
 0x20c   : > { %690 = vmatpush1.bf16.msra.mxu1 %v627_v36  ;;  %v732_v37 = vpop.permute.xlu1 %731 }
 0x20f   : > { %861 = vmatmul.mubr.msk.bf16.vlgmr.msra.gmra.mrb[4].mxu1 %vm642_vm9, %v641_v32 }
 0x211   : > { %v742_v41 = vpop.permute.xlu0 %741 }
 0x2da   : > { %v680_v38 = vpop.f32.mrb[0].mxu1 }
 0x2db   : > { %v734_v39 = vmul.f32 %v732_v37, %v680_v38  ;;  %v682_v40 = vpop.f32.mrb[1].mxu1 }
 0x2dc   : > { %v735_v25 = vmul.f32 %v732_v37, %v682_v40  ;;  %v684_v42 = vpop.f32.mrb[2].mxu1 }
 0x2dd   : > { %v744_v43 = vadd.f32 %v742_v41, %v734_v39  ;;  %v685_v44 = vpop.f32.mrb[3].mxu1 }
 0x2de   : > { %v745_v45 = vadd.f32 %v742_v41, %v735_v25 }
 0x2df   : > { %vm748_vm10 = vcmp.gt.f32.partialorder %v744_v43, 0.0  ;;  %v752_v3 = vmul.f32 0.01, %v744_v43 }
 0x2e0   : > { %vm749_vm11 = vcmp.gt.f32.partialorder %v745_v45, 0.0  ;;  %v753_v46 = vmul.f32 0.01, %v745_v45 }
 0x2e1   : > { %v756_v47 = vsel %vm748_vm10, %v744_v43, %v752_v3 }
 0x2e2   : > { %v757_v48 = vsel %vm749_vm11, %v745_v45, %v753_v46  ;;  %v721_v49 = vpop.f32.mrb[4].mxu1 }
 0x2e3   : > { %v736_v50 = vmul.f32 %v732_v37, %v721_v49  ;;  %v723_v51 = vpop.f32.mrb[5].mxu1  ;;  %v764_v52 = vcombine.low %v756_v47, %v757_v48 }
 0x2e4   : > { %v737_v53 = vmul.f32 %v732_v37, %v723_v51  ;;  %v725_v54 = vpop.f32.mrb[6].mxu1 }
 0x2e5   : > { %v746_v55 = vadd.f32 %v742_v41, %v736_v50  ;;  %v726_v56 = vpop.f32.mrb[7].mxu1  ;;  %768 = vst [vmem:[%s352_s25] sm:$0xff] %v764_v52 }
 0x2e6   : > { %v747_v57 = vadd.f32 %v742_v41, %v737_v53 }
 0x2e7   : > { %vm750_vm12 = vcmp.gt.f32.partialorder %v746_v55, 0.0  ;;  %v754_v58 = vmul.f32 0.01, %v746_v55 }
 0x2e8   : > { %vm751_vm13 = vcmp.gt.f32.partialorder %v747_v57, 0.0  ;;  %v755_v59 = vmul.f32 0.01, %v747_v57 }
 0x2e9   : > { %v758_v60 = vsel %vm750_vm12, %v746_v55, %v754_v58 }
 0x2ea   : > { %v759_v61 = vsel %vm751_vm13, %v747_v57, %v755_v59 }
 0x2eb   : > { %v765_v62 = vcombine.low %v758_v60, %v759_v61 }
 0x2ed   : > { %769 = vst [vmem:[%s352_s25 + $0x8] sm:$0xff] %v765_v62 }
 0x2ee   : > { %962 = shalt.err (!%p959_p3)
}
 0x2ef   : > { %s963_s27 = scalar_lea.hbm %s1223_s20, 256  ;;  %s967_s30 = scalar_lea.hbm %s1277_s10, 512 }
 0x2f0   : > { %p964_p4 = scmp.ne.s32.totalorder %s1223_s20, %s963_s27  ;;  %p968_p9 = scmp.lt.u32.totalorder %s1223_s20, %s1277_s10 }
 0x2f1   : > { %p969_p10 = scmp.lt.u32.totalorder %s967_s30, %s963_s27  ;;  %p971_p12 = scmp.lt.u32.totalorder %s963_s27, %s1223_s20 }
 0x2f2   : > { %p965_p7 = pnand %p964_p4, %p1111_p5 }
 0x2f3   : > { %p970_p11 = por %p969_p10, %p968_p9 }
 0x2f4   : > { %p966_p8 = pneg %p965_p7 }
 0x2f5   : > { %p972_p13 = por %p971_p12, %p970_p11 }
 0x2f7   : > { %p973_p0 = pnand %p972_p13, %p966_p8 }
 0x2f9   : > { %976 = shalt.err (!%p973_p0)
}
 0x2fa   : > { %897 = dma.vmem_to_hbm [thread:$0]  (%p1111_p5), %s1225_s29, 256, %s1223_s20, %s771_s21  }
 0x2fb PF: > { %p903_p1 = scmp.ge.s32.totalorder %s1011_s16, 2  ;;  %s797_s12 = sand.u32 1, %s999_s13  }
 0x2fc   : > { %s798_s26 = scalar_lea.sflag [#allocation4], %s797_s12 }
 0x2fd   : > { %p900_p2 = pnand %p903_p1, %p1115_p6 }
 0x2ff   : > { %994 = dma.done.wait (!%p900_p2), %s798_s26, 256  }
 0x300   : > { %996 = vsyncadd (!%p900_p2), %s798_s26, 4294967040  ;;  %p20_p3 = scmp.ge.s32.totalorder %s1098_s19, 4   ;;  %s1285_s13 = smov %s1003_s14 }
 0x301   : > { %s1286_s14 = smov %s1007_s15  ;;  %s1287_s15 = smov %s1109_s22 }
 0x302   : > { %s1288_s16 = smov %s1098_s19  ;;  %22 = sbr.rel (!%p20_p3) target bundleno = 3 (0x3), region = 98 }
 0x309   :  { %803 = vsyncpa [#allocation4], 1 }
 0x30a   :  { %805 = vsyncpa [#allocation4 + $0x1], 1 }

</bundles_post_ra>
